<compile_context>
chip_gen: v7x
topology: tpu7x:2x2x1
jax: 0.10.0
libtpu: 0.0.40
codegen_flags: <defaults>
</compile_context>

<pallas_src>
import functools

import numpy as np
import jax
import jax.numpy as jnp
from jax.experimental import pallas as pl
from jax.experimental.pallas import tpu as pltpu

F32 = jnp.float32


def _leaky(x, slope):
    return jnp.where(x >= 0, x, slope * x)


# ------------------------------------------------------------------
# Fused kernel: one grid step == one batch element
# ------------------------------------------------------------------
def net_gat_kernel(x_ref, wsub_ref, bsub_ref, w1_ref, b1_ref, gatw_ref, attc_ref,
                   adj_ref, idh_ref, gbias_ref, woutt_ref, bout_ref,
                   o_ref, xn_scr, feat_scr, *, N, GO, H, C):
    # ---- per-gene subnets (packed into one dense matmul) + LeakyReLU ----
    x_cat = jnp.dot(x_ref[...], wsub_ref[...], preferred_element_type=F32) + bsub_ref[...]
    x_cat = _leaky(x_cat, 0.01)                                   # cat_activate

    # ---- masked GO linear (mask folded into w1 at build time) + LeakyReLU ----
    # w1 columns are pre-permuted to node-major (n*GO + d) order.
    x_go = jnp.dot(x_cat, w1_ref[...], preferred_element_type=F32) + b1_ref[...]
    x_go = _leaky(x_go, 0.01)                                     # fc1_activate, (1, N*GO)

    # ---- re-layout to per-node features (N, GO) entirely in VMEM ----
    for n in range(N):
        xn_scr[n:n + 1, :] = x_go[:, n * GO:(n + 1) * GO]
    xn = xn_scr[...]                                              # (N, GO)

    # ---- GAT projection + attention scores (single matmuls, no kron) ----
    xl = jnp.dot(xn, gatw_ref[...], preferred_element_type=F32)   # (N, H*C)
    e = jnp.dot(xl, attc_ref[...], preferred_element_type=F32)    # (N, 2H) = [e_i | e_j]
    e_t = e.T                                                     # (2H, N)

    adj = adj_ref[...]                                            # (N, N), adj[t, s]
    acc = jnp.zeros((N, C), F32)
    for h in range(H):
        ei = e[:, h:h + 1]                                        # (N, 1)  target part
        ej = e_t[H + h:H + h + 1, :]                              # (1, N)  source part
        lg = _leaky(ei + ej, 0.2)                                 # (N_tgt, N_src)
        msk = jnp.where(adj > 0, lg, -1e30)
        mx = jnp.max(msk, axis=-1, keepdims=True)                 # reduce over lanes
        ex = jnp.exp(msk - mx) * adj
        den = jnp.sum(ex, axis=-1, keepdims=True)
        alpha = ex * jnp.where(den > 0, 1.0 / den, 0.0)           # edge softmax per target
        acc = acc + jnp.dot(alpha, xl[:, h * C:(h + 1) * C],
                            preferred_element_type=F32)           # (N, C)

    # mean over incoming edges & heads (precomputed 1/(deg*H)), bias, activation
    node = acc * idh_ref[...] + gbias_ref[...]                    # (N, C)
    act = _leaky(node, 0.01)                                      # gat_activate
    # TODO(synk): gat_drop (nn.Dropout, p=0.5) is identity in eval mode.

    # ---- flatten to channel-major (c*N + n) order, matching the PyTorch reshape ----
    act_t = act.T                                                 # (C, N)
    for c in range(C):
        feat_scr[0:1, c * N:(c + 1) * N] = act_t[c:c + 1, :]

    # ---- output linear ----
    o_ref[...] = jnp.dot(feat_scr[...], woutt_ref[...],
                         preferred_element_type=F32) + bout_ref[...]


# ------------------------------------------------------------------
# Wrapper
# ------------------------------------------------------------------
def net_gat_forward(x, params, cfg):
    B = x.shape[0]
    N, GO, H, C = cfg["num_gos"], cfg["go_dim"], cfg["heads"], cfg["gat_out"]
    K = cfg["num_output"]
    F_in = cfg["num_tf"] * cfg["total_peaks"]

    x3 = x.reshape(B, 1, F_in)                                    # unit dim -> clean (1, F) blocks

    def _const_spec(a):
        nd = a.ndim
        return pl.BlockSpec(a.shape, lambda b, _nd=nd: (0,) * _nd)  # weights stay VMEM-resident

    weights = (params["w_sub"], params["b_sub"], params["w1m"], params["b1"],
               params["gat_w"], params["att_cat"], params["adj"], params["inv_deg_h"],
               params["gat_bias"], params["w_out_t"], params["b_out"])

    kernel = functools.partial(net_gat_kernel, N=N, GO=GO, H=H, C=C)

    out3 = pl.pallas_call(
        kernel,
        out_shape=jax.ShapeDtypeStruct((B, 1, K), F32),
        grid=(B,),
        in_specs=[pl.BlockSpec((None, 1, F_in), lambda b: (b, 0, 0))]
                 + [_const_spec(w) for w in weights],
        out_specs=pl.BlockSpec((None, 1, K), lambda b: (b, 0, 0)),
        scratch_shapes=[pltpu.VMEM((N, GO), F32),
                        pltpu.VMEM((1, C * N), F32)],
        compiler_params=pltpu.CompilerParams(dimension_semantics=("parallel",)),
    )(x3, *weights)
    return out3.reshape(B, K)


# ------------------------------------------------------------------
# Deterministic parameter construction (synthetic, PRNGKey(0)-derived)
# ------------------------------------------------------------------
def build_params(key):
    cfg = dict(
        B=2, num_tf=4, num_peaks=[3, 2, 4, 3, 2],
        num_gos=8, go_dim=6, num_output=3, heads=2, gat_out=4,
    )
    num_tf = cfg["num_tf"]
    num_peaks = cfg["num_peaks"]
    G = len(num_peaks)
    cut = [0]
    for npk in num_peaks:
        cut.append(cut[-1] + npk)
    cfg["cut"] = cut
    cfg["total_peaks"] = cut[-1]
    total_peaks = cut[-1]
    N, GO, H, C = cfg["num_gos"], cfg["go_dim"], cfg["heads"], cfg["gat_out"]
    num_output = cfg["num_output"]

    ks = jax.random.split(key, G + 8)

    raw = {}
    raw["sub_w"] = []
    raw["sub_b"] = []
    for i in range(G):
        kw, kb = jax.random.split(ks[i])
        raw["sub_w"].append(jax.random.normal(kw, (num_tf * num_peaks[i],), F32) * 0.1)
        raw["sub_b"].append(jax.random.normal(kb, (), F32) * 0.1)
    raw["fc1_weight"] = jax.random.normal(ks[G + 0], (N * GO, G), F32) * 0.2
    raw["fc1_bias"] = jax.random.normal(ks[G + 1], (N * GO,), F32) * 0.1
    mask_np = (((np.arange(N)[:, None] + np.arange(G)[None, :]) % 3) != 0).astype(np.float32)
    raw["mask"] = jnp.asarray(mask_np)
    raw["gat_w"] = jax.random.normal(ks[G + 2], (GO, H * C), F32) * 0.3
    raw["att"] = jax.random.normal(ks[G + 3], (H, 2 * C), F32) * 0.3
    raw["gat_bias"] = jax.random.normal(ks[G + 4], (C,), F32) * 0.1
    raw["w_out"] = jax.random.normal(ks[G + 5], (num_output, C * N), F32) * 0.1
    raw["b_out"] = jax.random.normal(ks[G + 6], (num_output,), F32) * 0.1
    # small deterministic DAG over GO nodes: (source, target)
    edges = []
    for n in range(1, N):
        edges.append((n - 1, n))
        if n >= 2:
            edges.append((n - 2, n))
    raw["edges"] = np.asarray(edges, np.int32)

    # ---- pack for the fused kernel ----
    # per-gene subnets packed into one dense (num_tf*total_peaks, G) matrix
    w_sub = np.zeros((num_tf * total_peaks, G), np.float32)
    b_sub = np.zeros((1, G), np.float32)
    for i in range(G):
        wi = np.asarray(raw["sub_w"][i])
        npk = num_peaks[i]
        for t in range(num_tf):
            w_sub[t * total_peaks + cut[i]:t * total_peaks + cut[i] + npk, i] = \
                wi[t * npk:(t + 1) * npk]
        b_sub[0, i] = float(raw["sub_b"][i])

    # fc1: fold the GO mask in and permute output columns from (d*N + n) to (n*GO + d)
    mask_rep = np.repeat(mask_np, GO, axis=0)                         # (N*GO, G)
    w1m_base = (np.asarray(raw["fc1_weight"]) * mask_rep).T           # (G, N*GO), col = d*N + n
    w1m = w1m_base.reshape(G, GO, N).transpose(0, 2, 1).reshape(G, N * GO)
    b1 = np.asarray(raw["fc1_bias"]).reshape(GO, N).T.reshape(1, N * GO)

    # concatenated attention matrix: e = xl @ att_cat -> [e_i | e_j]
    att = np.asarray(raw["att"])
    att_cat = np.zeros((H * C, 2 * H), np.float32)
    for h in range(H):
        for c in range(C):
            att_cat[h * C + c, h] = att[h, c]
            att_cat[h * C + c, H + h] = att[h, C + c]

    adj = np.zeros((N, N), np.float32)
    for s, t in raw["edges"]:
        adj[t, s] = 1.0
    deg = adj.sum(axis=1)
    inv_deg_h = (np.where(deg > 0, 1.0 / np.maximum(deg, 1.0), 0.0) / H).reshape(N, 1)

    params = dict(
        w_sub=jnp.asarray(w_sub), b_sub=jnp.asarray(b_sub),
        w1m=jnp.asarray(w1m), b1=jnp.asarray(b1),
        gat_w=jnp.asarray(raw["gat_w"]),
        att_cat=jnp.asarray(att_cat),
        adj=jnp.asarray(adj),
        inv_deg_h=jnp.asarray(inv_deg_h.astype(np.float32)),
        gat_bias=jnp.asarray(raw["gat_bias"]).reshape(1, -1),
        w_out_t=jnp.asarray(raw["w_out"]).T,                          # (C*N, K), c*N+n row order
        b_out=jnp.asarray(raw["b_out"]).reshape(1, -1),
    )
    return cfg, raw, params


# ------------------------------------------------------------------
# Pure-JAX reference (edge-list formulation, mirrors the PyTorch/PyG semantics)
# ------------------------------------------------------------------
def reference_forward(x, raw, cfg):
    B = x.shape[0]
    cut = cfg["cut"]
    G = len(cfg["num_peaks"])
    N, GO, H, C = cfg["num_gos"], cfg["go_dim"], cfg["heads"], cfg["gat_out"]

    outs = []
    for i in range(G):
        xs = x[:, :, cut[i]:cut[i + 1]].reshape(B, -1)
        outs.append(xs @ raw["sub_w"][i][:, None] + raw["sub_b"][i])
    x_cat = jnp.concatenate(outs, axis=1)
    x_cat = jnp.where(x_cat >= 0, x_cat, 0.01 * x_cat)

    mask_rep = jnp.repeat(raw["mask"], GO, axis=0)
    x_go = x_cat @ (raw["fc1_weight"] * mask_rep).T + raw["fc1_bias"]
    x_go = jnp.where(x_go >= 0, x_go, 0.01 * x_go)

    xn = x_go.reshape(B, GO, N).transpose(2, 0, 1)                    # (N, B, GO)
    xl = jnp.einsum("nbi,io->nbo", xn, raw["gat_w"])                  # (N, B, H*C)
    xl4 = xl.reshape(N, B, H, C)

    src = jnp.asarray(raw["edges"][:, 0])
    dst = jnp.asarray(raw["edges"][:, 1])
    x_i, x_j = xl4[dst], xl4[src]                                     # (E, B, H, C)
    att = raw["att"]
    alpha = jnp.sum(x_i * att[None, None, :, :C], -1) + jnp.sum(x_j * att[None, None, :, C:], -1)
    alpha = jnp.where(alpha >= 0, alpha, 0.2 * alpha)
    amax = jax.ops.segment_max(alpha, dst, num_segments=N)
    alpha = jnp.exp(alpha - amax[dst])
    asum = jax.ops.segment_sum(alpha, dst, num_segments=N)
    alpha = alpha / asum[dst]
    msg = x_j * alpha[..., None]
    aggr = jax.ops.segment_sum(msg, dst, num_segments=N)
    cnt = jax.ops.segment_sum(jnp.ones((dst.shape[0],), F32), dst, num_segments=N)
    aggr = aggr / jnp.maximum(cnt, 1.0)[:, None, None, None]
    node_out = aggr.mean(axis=2) + raw["gat_bias"]                    # (N, B, C)

    feat = node_out.transpose(1, 2, 0).reshape(B, -1)                 # (B, C*N)
    feat = jnp.where(feat >= 0, feat, 0.01 * feat)
    return feat @ raw["w_out"].T + raw["b_out"]


if __name__ == "__main__":
    key = jax.random.PRNGKey(0)
    kp, kx = jax.random.split(key)
    cfg, raw, params = build_params(kp)

    x = jax.random.normal(kx, (cfg["B"], cfg["num_tf"], cfg["total_peaks"]), F32)

    out = jax.block_until_ready(net_gat_forward(x, params, cfg))
    ref = jax.block_until_ready(reference_forward(x, raw, cfg))
    np.testing.assert_allclose(np.asarray(out), np.asarray(ref), rtol=1e-2, atol=1e-2)

    print("KERNEL_OK")
</pallas_src>

<mosaic_0001>
module attributes {stable_mosaic.version = 11 : i64} {
  func.func @net_gat_kernel(%arg0: i32, %arg1: memref<1x1x56xf32, #tpu.memory_space<vmem>>, %arg2: memref<56x5xf32, #tpu.memory_space<vmem>>, %arg3: memref<1x5xf32, #tpu.memory_space<vmem>>, %arg4: memref<5x48xf32, #tpu.memory_space<vmem>>, %arg5: memref<1x48xf32, #tpu.memory_space<vmem>>, %arg6: memref<6x8xf32, #tpu.memory_space<vmem>>, %arg7: memref<8x4xf32, #tpu.memory_space<vmem>>, %arg8: memref<8x8xf32, #tpu.memory_space<vmem>>, %arg9: memref<8x1xf32, #tpu.memory_space<vmem>>, %arg10: memref<1x4xf32, #tpu.memory_space<vmem>>, %arg11: memref<32x3xf32, #tpu.memory_space<vmem>>, %arg12: memref<1x3xf32, #tpu.memory_space<vmem>>, %arg13: memref<1x1x3xf32, #tpu.memory_space<vmem>>, %arg14: memref<8x6xf32, #tpu.memory_space<vmem>>, %arg15: memref<1x32xf32, #tpu.memory_space<vmem>>) attributes {dimension_semantics = [#tpu.dimension_semantics<parallel>], iteration_bounds = array<i64: 2>, scalar_prefetch = 0 : i64, scratch_operands = 2 : i64, tpu.core_type = #tpu.core_type<tc>, window_params = [{transform_indices = @transform_0, window_bounds = array<i64: 1, 1, 56>}, {pipeline_mode = #tpu.pipeline_mode<synchronous>, transform_indices = @transform_1, window_bounds = array<i64: 56, 5>}, {pipeline_mode = #tpu.pipeline_mode<synchronous>, transform_indices = @transform_2, window_bounds = array<i64: 1, 5>}, {pipeline_mode = #tpu.pipeline_mode<synchronous>, transform_indices = @transform_3, window_bounds = array<i64: 5, 48>}, {pipeline_mode = #tpu.pipeline_mode<synchronous>, transform_indices = @transform_4, window_bounds = array<i64: 1, 48>}, {pipeline_mode = #tpu.pipeline_mode<synchronous>, transform_indices = @transform_5, window_bounds = array<i64: 6, 8>}, {pipeline_mode = #tpu.pipeline_mode<synchronous>, transform_indices = @transform_6, window_bounds = array<i64: 8, 4>}, {pipeline_mode = #tpu.pipeline_mode<synchronous>, transform_indices = @transform_7, window_bounds = array<i64: 8, 8>}, {pipeline_mode = #tpu.pipeline_mode<synchronous>, transform_indices = @transform_8, window_bounds = array<i64: 8, 1>}, {pipeline_mode = #tpu.pipeline_mode<synchronous>, transform_indices = @transform_9, window_bounds = array<i64: 1, 4>}, {pipeline_mode = #tpu.pipeline_mode<synchronous>, transform_indices = @transform_10, window_bounds = array<i64: 32, 3>}, {pipeline_mode = #tpu.pipeline_mode<synchronous>, transform_indices = @transform_11, window_bounds = array<i64: 1, 3>}, {transform_indices = @transform_12, window_bounds = array<i64: 1, 1, 3>}]} {
    %c0 = arith.constant 0 : index
    %c0_0 = arith.constant 0 : index
    %c0_1 = arith.constant 0 : index
    %0 = vector.load %arg1[%c0, %c0_0, %c0_1] : memref<1x1x56xf32, #tpu.memory_space<vmem>>, vector<1x1x56xf32>
    %1 = vector.shape_cast %0 : vector<1x1x56xf32> to vector<1x56xf32>
    %c0_2 = arith.constant 0 : index
    %c0_3 = arith.constant 0 : index
    %2 = vector.load %arg2[%c0_2, %c0_3] : memref<56x5xf32, #tpu.memory_space<vmem>>, vector<56x5xf32>
    %cst = arith.constant dense<0.000000e+00> : vector<1x5xf32>
    %3 = tpu.matmul %1, %2, %cst {dimension_numbers = #tpu.dot_dimension_numbers<[1], [0], [0], [1], [0, 0, 1, 1], [], []>} : vector<1x56xf32>, vector<56x5xf32>, vector<1x5xf32> -> vector<1x5xf32>
    %c0_4 = arith.constant 0 : index
    %c0_5 = arith.constant 0 : index
    %4 = vector.load %arg3[%c0_4, %c0_5] : memref<1x5xf32, #tpu.memory_space<vmem>>, vector<1x5xf32>
    %5 = arith.addf %3, %4 : vector<1x5xf32>
    %cst_6 = arith.constant 0.000000e+00 : f32
    %6 = vector.broadcast %cst_6 : f32 to vector<1x5xf32>
    %7 = arith.cmpf oge, %5, %6 : vector<1x5xf32>
    %cst_7 = arith.constant 0.00999999977 : f32
    %8 = vector.broadcast %cst_7 : f32 to vector<1x5xf32>
    %9 = arith.mulf %8, %5 : vector<1x5xf32>
    %10 = arith.select %7, %5, %9 : vector<1x5xi1>, vector<1x5xf32>
    %c0_8 = arith.constant 0 : index
    %c0_9 = arith.constant 0 : index
    %11 = vector.load %arg4[%c0_8, %c0_9] : memref<5x48xf32, #tpu.memory_space<vmem>>, vector<5x48xf32>
    %cst_10 = arith.constant dense<0.000000e+00> : vector<1x48xf32>
    %12 = tpu.matmul %10, %11, %cst_10 {dimension_numbers = #tpu.dot_dimension_numbers<[1], [0], [0], [1], [0, 0, 1, 1], [], []>} : vector<1x5xf32>, vector<5x48xf32>, vector<1x48xf32> -> vector<1x48xf32>
    %c0_11 = arith.constant 0 : index
    %c0_12 = arith.constant 0 : index
    %13 = vector.load %arg5[%c0_11, %c0_12] : memref<1x48xf32, #tpu.memory_space<vmem>>, vector<1x48xf32>
    %14 = arith.addf %12, %13 : vector<1x48xf32>
    %cst_13 = arith.constant 0.000000e+00 : f32
    %15 = vector.broadcast %cst_13 : f32 to vector<1x48xf32>
    %16 = arith.cmpf oge, %14, %15 : vector<1x48xf32>
    %cst_14 = arith.constant 0.00999999977 : f32
    %17 = vector.broadcast %cst_14 : f32 to vector<1x48xf32>
    %18 = arith.mulf %17, %14 : vector<1x48xf32>
    %19 = arith.select %16, %14, %18 : vector<1x48xi1>, vector<1x48xf32>
    %20 = vector.extract_strided_slice %19 {offsets = [0, 0], sizes = [1, 6], strides = [1, 1]} : vector<1x48xf32> to vector<1x6xf32>
    %c0_15 = arith.constant 0 : index
    %c0_16 = arith.constant 0 : index
    %21 = vector.load %arg14[%c0_15, %c0_16] : memref<8x6xf32, #tpu.memory_space<vmem>>, vector<1x6xf32>
    tpu.vector_store %arg14[%c0_15, %c0_16], %20 {strides = array<i32>} : memref<8x6xf32, #tpu.memory_space<vmem>>, vector<1x6xf32>,
    %22 = vector.extract_strided_slice %19 {offsets = [0, 6], sizes = [1, 6], strides = [1, 1]} : vector<1x48xf32> to vector<1x6xf32>
    %c1 = arith.constant 1 : index
    %c0_17 = arith.constant 0 : index
    %23 = vector.load %arg14[%c1, %c0_17] : memref<8x6xf32, #tpu.memory_space<vmem>>, vector<1x6xf32>
    tpu.vector_store %arg14[%c1, %c0_17], %22 {strides = array<i32>} : memref<8x6xf32, #tpu.memory_space<vmem>>, vector<1x6xf32>,
    %24 = vector.extract_strided_slice %19 {offsets = [0, 12], sizes = [1, 6], strides = [1, 1]} : vector<1x48xf32> to vector<1x6xf32>
    %c2 = arith.constant 2 : index
    %c0_18 = arith.constant 0 : index
    %25 = vector.load %arg14[%c2, %c0_18] : memref<8x6xf32, #tpu.memory_space<vmem>>, vector<1x6xf32>
    tpu.vector_store %arg14[%c2, %c0_18], %24 {strides = array<i32>} : memref<8x6xf32, #tpu.memory_space<vmem>>, vector<1x6xf32>,
    %26 = vector.extract_strided_slice %19 {offsets = [0, 18], sizes = [1, 6], strides = [1, 1]} : vector<1x48xf32> to vector<1x6xf32>
    %c3 = arith.constant 3 : index
    %c0_19 = arith.constant 0 : index
    %27 = vector.load %arg14[%c3, %c0_19] : memref<8x6xf32, #tpu.memory_space<vmem>>, vector<1x6xf32>
    tpu.vector_store %arg14[%c3, %c0_19], %26 {strides = array<i32>} : memref<8x6xf32, #tpu.memory_space<vmem>>, vector<1x6xf32>,
    %28 = vector.extract_strided_slice %19 {offsets = [0, 24], sizes = [1, 6], strides = [1, 1]} : vector<1x48xf32> to vector<1x6xf32>
    %c4 = arith.constant 4 : index
    %c0_20 = arith.constant 0 : index
    %29 = vector.load %arg14[%c4, %c0_20] : memref<8x6xf32, #tpu.memory_space<vmem>>, vector<1x6xf32>
    tpu.vector_store %arg14[%c4, %c0_20], %28 {strides = array<i32>} : memref<8x6xf32, #tpu.memory_space<vmem>>, vector<1x6xf32>,
    %30 = vector.extract_strided_slice %19 {offsets = [0, 30], sizes = [1, 6], strides = [1, 1]} : vector<1x48xf32> to vector<1x6xf32>
    %c5 = arith.constant 5 : index
    %c0_21 = arith.constant 0 : index
    %31 = vector.load %arg14[%c5, %c0_21] : memref<8x6xf32, #tpu.memory_space<vmem>>, vector<1x6xf32>
    tpu.vector_store %arg14[%c5, %c0_21], %30 {strides = array<i32>} : memref<8x6xf32, #tpu.memory_space<vmem>>, vector<1x6xf32>,
    %32 = vector.extract_strided_slice %19 {offsets = [0, 36], sizes = [1, 6], strides = [1, 1]} : vector<1x48xf32> to vector<1x6xf32>
    %c6 = arith.constant 6 : index
    %c0_22 = arith.constant 0 : index
    %33 = vector.load %arg14[%c6, %c0_22] : memref<8x6xf32, #tpu.memory_space<vmem>>, vector<1x6xf32>
    tpu.vector_store %arg14[%c6, %c0_22], %32 {strides = array<i32>} : memref<8x6xf32, #tpu.memory_space<vmem>>, vector<1x6xf32>,
    %34 = vector.extract_strided_slice %19 {offsets = [0, 42], sizes = [1, 6], strides = [1, 1]} : vector<1x48xf32> to vector<1x6xf32>
    %c7 = arith.constant 7 : index
    %c0_23 = arith.constant 0 : index
    %35 = vector.load %arg14[%c7, %c0_23] : memref<8x6xf32, #tpu.memory_space<vmem>>, vector<1x6xf32>
    tpu.vector_store %arg14[%c7, %c0_23], %34 {strides = array<i32>} : memref<8x6xf32, #tpu.memory_space<vmem>>, vector<1x6xf32>,
    %c0_24 = arith.constant 0 : index
    %c0_25 = arith.constant 0 : index
    %36 = vector.load %arg14[%c0_24, %c0_25] : memref<8x6xf32, #tpu.memory_space<vmem>>, vector<8x6xf32>
    %c0_26 = arith.constant 0 : index
    %c0_27 = arith.constant 0 : index
    %37 = vector.load %arg6[%c0_26, %c0_27] : memref<6x8xf32, #tpu.memory_space<vmem>>, vector<6x8xf32>
    %cst_28 = arith.constant dense<0.000000e+00> : vector<8x8xf32>
    %38 = tpu.matmul %36, %37, %cst_28 {dimension_numbers = #tpu.dot_dimension_numbers<[1], [0], [0], [1], [0, 0, 1, 1], [], []>} : vector<8x6xf32>, vector<6x8xf32>, vector<8x8xf32> -> vector<8x8xf32>
    %c0_29 = arith.constant 0 : index
    %c0_30 = arith.constant 0 : index
    %39 = vector.load %arg7[%c0_29, %c0_30] : memref<8x4xf32, #tpu.memory_space<vmem>>, vector<8x4xf32>
    %cst_31 = arith.constant dense<0.000000e+00> : vector<8x4xf32>
    %40 = tpu.matmul %38, %39, %cst_31 {dimension_numbers = #tpu.dot_dimension_numbers<[1], [0], [0], [1], [0, 0, 1, 1], [], []>} : vector<8x8xf32>, vector<8x4xf32>, vector<8x4xf32> -> vector<8x4xf32>
    %41 = tpu.transpose %40, [1, 0] : vector<8x4xf32> -> vector<4x8xf32>
    %c0_32 = arith.constant 0 : index
    %c0_33 = arith.constant 0 : index
    %42 = vector.load %arg8[%c0_32, %c0_33] : memref<8x8xf32, #tpu.memory_space<vmem>>, vector<8x8xf32>
    %cst_34 = arith.constant 0.000000e+00 : f32
    %43 = vector.broadcast %cst_34 : f32 to vector<8x4xf32>
    %44 = vector.extract_strided_slice %40 {offsets = [0, 0], sizes = [8, 1], strides = [1, 1]} : vector<8x4xf32> to vector<8x1xf32>
    %45 = vector.extract_strided_slice %41 {offsets = [2, 0], sizes = [1, 8], strides = [1, 1]} : vector<4x8xf32> to vector<1x8xf32>
    %46 = vector.broadcast %44 : vector<8x1xf32> to vector<8x8xf32>
    %47 = vector.broadcast %45 : vector<1x8xf32> to vector<8x8xf32>
    %48 = arith.addf %46, %47 : vector<8x8xf32>
    %cst_35 = arith.constant 0.000000e+00 : f32
    %49 = vector.broadcast %cst_35 : f32 to vector<8x8xf32>
    %50 = arith.cmpf oge, %48, %49 : vector<8x8xf32>
    %cst_36 = arith.constant 2.000000e-01 : f32
    %51 = vector.broadcast %cst_36 : f32 to vector<8x8xf32>
    %52 = arith.mulf %51, %48 : vector<8x8xf32>
    %53 = arith.select %50, %48, %52 : vector<8x8xi1>, vector<8x8xf32>
    %cst_37 = arith.constant 0.000000e+00 : f32
    %54 = vector.broadcast %cst_37 : f32 to vector<8x8xf32>
    %55 = arith.cmpf ogt, %42, %54 : vector<8x8xf32>
    %cst_38 = arith.constant -1.000000e+30 : f32
    %56 = vector.broadcast %cst_38 : f32 to vector<8x8xf32>
    %57 = arith.select %55, %53, %56 : vector<8x8xi1>, vector<8x8xf32>
    %cst_39 = arith.constant dense<0xFF800000> : vector<8xf32>
    %58 = vector.multi_reduction <maximumf>, %57, %cst_39 [1] : vector<8x8xf32> to vector<8xf32>
    %59 = vector.shape_cast %58 : vector<8xf32> to vector<8x1xf32>
    %60 = vector.broadcast %59 : vector<8x1xf32> to vector<8x8xf32>
    %61 = arith.subf %57, %60 : vector<8x8xf32>
    %62 = math.exp %61 : vector<8x8xf32>
    %63 = arith.mulf %62, %42 : vector<8x8xf32>
    %cst_40 = arith.constant dense<0.000000e+00> : vector<8xf32>
    %64 = vector.multi_reduction <add>, %63, %cst_40 [1] : vector<8x8xf32> to vector<8xf32>
    %65 = vector.shape_cast %64 : vector<8xf32> to vector<8x1xf32>
    %cst_41 = arith.constant 0.000000e+00 : f32
    %66 = vector.broadcast %cst_41 : f32 to vector<8x1xf32>
    %67 = arith.cmpf ogt, %65, %66 : vector<8x1xf32>
    %cst_42 = arith.constant 1.000000e+00 : f32
    %68 = vector.broadcast %cst_42 : f32 to vector<8x1xf32>
    %69 = arith.divf %68, %65 : vector<8x1xf32>
    %cst_43 = arith.constant 0.000000e+00 : f32
    %70 = vector.broadcast %cst_43 : f32 to vector<8x1xf32>
    %71 = arith.select %67, %69, %70 : vector<8x1xi1>, vector<8x1xf32>
    %72 = vector.broadcast %71 : vector<8x1xf32> to vector<8x8xf32>
    %73 = arith.mulf %63, %72 : vector<8x8xf32>
    %74 = vector.extract_strided_slice %38 {offsets = [0, 0], sizes = [8, 4], strides = [1, 1]} : vector<8x8xf32> to vector<8x4xf32>
    %cst_44 = arith.constant dense<0.000000e+00> : vector<8x4xf32>
    %75 = tpu.matmul %73, %74, %cst_44 {dimension_numbers = #tpu.dot_dimension_numbers<[1], [0], [0], [1], [0, 0, 1, 1], [], []>} : vector<8x8xf32>, vector<8x4xf32>, vector<8x4xf32> -> vector<8x4xf32>
    %76 = arith.addf %43, %75 : vector<8x4xf32>
    %77 = vector.extract_strided_slice %40 {offsets = [0, 1], sizes = [8, 1], strides = [1, 1]} : vector<8x4xf32> to vector<8x1xf32>
    %78 = vector.extract_strided_slice %41 {offsets = [3, 0], sizes = [1, 8], strides = [1, 1]} : vector<4x8xf32> to vector<1x8xf32>
    %79 = vector.broadcast %77 : vector<8x1xf32> to vector<8x8xf32>
    %80 = vector.broadcast %78 : vector<1x8xf32> to vector<8x8xf32>
    %81 = arith.addf %79, %80 : vector<8x8xf32>
    %cst_45 = arith.constant 0.000000e+00 : f32
    %82 = vector.broadcast %cst_45 : f32 to vector<8x8xf32>
    %83 = arith.cmpf oge, %81, %82 : vector<8x8xf32>
    %cst_46 = arith.constant 2.000000e-01 : f32
    %84 = vector.broadcast %cst_46 : f32 to vector<8x8xf32>
    %85 = arith.mulf %84, %81 : vector<8x8xf32>
    %86 = arith.select %83, %81, %85 : vector<8x8xi1>, vector<8x8xf32>
    %cst_47 = arith.constant 0.000000e+00 : f32
    %87 = vector.broadcast %cst_47 : f32 to vector<8x8xf32>
    %88 = arith.cmpf ogt, %42, %87 : vector<8x8xf32>
    %cst_48 = arith.constant -1.000000e+30 : f32
    %89 = vector.broadcast %cst_48 : f32 to vector<8x8xf32>
    %90 = arith.select %88, %86, %89 : vector<8x8xi1>, vector<8x8xf32>
    %cst_49 = arith.constant dense<0xFF800000> : vector<8xf32>
    %91 = vector.multi_reduction <maximumf>, %90, %cst_49 [1] : vector<8x8xf32> to vector<8xf32>
    %92 = vector.shape_cast %91 : vector<8xf32> to vector<8x1xf32>
    %93 = vector.broadcast %92 : vector<8x1xf32> to vector<8x8xf32>
    %94 = arith.subf %90, %93 : vector<8x8xf32>
    %95 = math.exp %94 : vector<8x8xf32>
    %96 = arith.mulf %95, %42 : vector<8x8xf32>
    %cst_50 = arith.constant dense<0.000000e+00> : vector<8xf32>
    %97 = vector.multi_reduction <add>, %96, %cst_50 [1] : vector<8x8xf32> to vector<8xf32>
    %98 = vector.shape_cast %97 : vector<8xf32> to vector<8x1xf32>
    %cst_51 = arith.constant 0.000000e+00 : f32
    %99 = vector.broadcast %cst_51 : f32 to vector<8x1xf32>
    %100 = arith.cmpf ogt, %98, %99 : vector<8x1xf32>
    %cst_52 = arith.constant 1.000000e+00 : f32
    %101 = vector.broadcast %cst_52 : f32 to vector<8x1xf32>
    %102 = arith.divf %101, %98 : vector<8x1xf32>
    %cst_53 = arith.constant 0.000000e+00 : f32
    %103 = vector.broadcast %cst_53 : f32 to vector<8x1xf32>
    %104 = arith.select %100, %102, %103 : vector<8x1xi1>, vector<8x1xf32>
    %105 = vector.broadcast %104 : vector<8x1xf32> to vector<8x8xf32>
    %106 = arith.mulf %96, %105 : vector<8x8xf32>
    %107 = vector.extract_strided_slice %38 {offsets = [0, 4], sizes = [8, 4], strides = [1, 1]} : vector<8x8xf32> to vector<8x4xf32>
    %cst_54 = arith.constant dense<0.000000e+00> : vector<8x4xf32>
    %108 = tpu.matmul %106, %107, %cst_54 {dimension_numbers = #tpu.dot_dimension_numbers<[1], [0], [0], [1], [0, 0, 1, 1], [], []>} : vector<8x8xf32>, vector<8x4xf32>, vector<8x4xf32> -> vector<8x4xf32>
    %109 = arith.addf %76, %108 : vector<8x4xf32>
    %c0_55 = arith.constant 0 : index
    %c0_56 = arith.constant 0 : index
    %110 = vector.load %arg9[%c0_55, %c0_56] : memref<8x1xf32, #tpu.memory_space<vmem>>, vector<8x1xf32>
    %111 = vector.broadcast %110 : vector<8x1xf32> to vector<8x4xf32>
    %112 = arith.mulf %109, %111 : vector<8x4xf32>
    %c0_57 = arith.constant 0 : index
    %c0_58 = arith.constant 0 : index
    %113 = vector.load %arg10[%c0_57, %c0_58] : memref<1x4xf32, #tpu.memory_space<vmem>>, vector<1x4xf32>
    %114 = vector.broadcast %113 : vector<1x4xf32> to vector<8x4xf32>
    %115 = arith.addf %112, %114 : vector<8x4xf32>
    %cst_59 = arith.constant 0.000000e+00 : f32
    %116 = vector.broadcast %cst_59 : f32 to vector<8x4xf32>
    %117 = arith.cmpf oge, %115, %116 : vector<8x4xf32>
    %cst_60 = arith.constant 0.00999999977 : f32
    %118 = vector.broadcast %cst_60 : f32 to vector<8x4xf32>
    %119 = arith.mulf %118, %115 : vector<8x4xf32>
    %120 = arith.select %117, %115, %119 : vector<8x4xi1>, vector<8x4xf32>
    %121 = tpu.transpose %120, [1, 0] : vector<8x4xf32> -> vector<4x8xf32>
    %122 = vector.extract_strided_slice %121 {offsets = [0, 0], sizes = [1, 8], strides = [1, 1]} : vector<4x8xf32> to vector<1x8xf32>
    %c0_61 = arith.constant 0 : index
    %c0_62 = arith.constant 0 : index
    %123 = vector.load %arg15[%c0_61, %c0_62] : memref<1x32xf32, #tpu.memory_space<vmem>>, vector<1x8xf32>
    tpu.vector_store %arg15[%c0_61, %c0_62], %122 {strides = array<i32>} : memref<1x32xf32, #tpu.memory_space<vmem>>, vector<1x8xf32>,
    %124 = vector.extract_strided_slice %121 {offsets = [1, 0], sizes = [1, 8], strides = [1, 1]} : vector<4x8xf32> to vector<1x8xf32>
    %c0_63 = arith.constant 0 : index
    %c8 = arith.constant 8 : index
    %125 = vector.load %arg15[%c0_63, %c8] : memref<1x32xf32, #tpu.memory_space<vmem>>, vector<1x8xf32>
    tpu.vector_store %arg15[%c0_63, %c8], %124 {strides = array<i32>} : memref<1x32xf32, #tpu.memory_space<vmem>>, vector<1x8xf32>,
    %126 = vector.extract_strided_slice %121 {offsets = [2, 0], sizes = [1, 8], strides = [1, 1]} : vector<4x8xf32> to vector<1x8xf32>
    %c0_64 = arith.constant 0 : index
    %c16 = arith.constant 16 : index
    %127 = vector.load %arg15[%c0_64, %c16] : memref<1x32xf32, #tpu.memory_space<vmem>>, vector<1x8xf32>
    tpu.vector_store %arg15[%c0_64, %c16], %126 {strides = array<i32>} : memref<1x32xf32, #tpu.memory_space<vmem>>, vector<1x8xf32>,
    %128 = vector.extract_strided_slice %121 {offsets = [3, 0], sizes = [1, 8], strides = [1, 1]} : vector<4x8xf32> to vector<1x8xf32>
    %c0_65 = arith.constant 0 : index
    %c24 = arith.constant 24 : index
    %129 = vector.load %arg15[%c0_65, %c24] : memref<1x32xf32, #tpu.memory_space<vmem>>, vector<1x8xf32>
    tpu.vector_store %arg15[%c0_65, %c24], %128 {strides = array<i32>} : memref<1x32xf32, #tpu.memory_space<vmem>>, vector<1x8xf32>,
    %c0_66 = arith.constant 0 : index
    %c0_67 = arith.constant 0 : index
    %130 = vector.load %arg15[%c0_66, %c0_67] : memref<1x32xf32, #tpu.memory_space<vmem>>, vector<1x32xf32>
    %c0_68 = arith.constant 0 : index
    %c0_69 = arith.constant 0 : index
    %131 = vector.load %arg11[%c0_68, %c0_69] : memref<32x3xf32, #tpu.memory_space<vmem>>, vector<32x3xf32>
    %cst_70 = arith.constant dense<0.000000e+00> : vector<1x3xf32>
    %132 = tpu.matmul %130, %131, %cst_70 {dimension_numbers = #tpu.dot_dimension_numbers<[1], [0], [0], [1], [0, 0, 1, 1], [], []>} : vector<1x32xf32>, vector<32x3xf32>, vector<1x3xf32> -> vector<1x3xf32>
    %c0_71 = arith.constant 0 : index
    %c0_72 = arith.constant 0 : index
    %133 = vector.load %arg12[%c0_71, %c0_72] : memref<1x3xf32, #tpu.memory_space<vmem>>, vector<1x3xf32>
    %134 = arith.addf %132, %133 : vector<1x3xf32>
    %c0_73 = arith.constant 0 : index
    %c0_74 = arith.constant 0 : index
    %c0_75 = arith.constant 0 : index
    %135 = vector.load %arg13[%c0_73, %c0_74, %c0_75] : memref<1x1x3xf32, #tpu.memory_space<vmem>>, vector<1x1x3xf32>
    %136 = vector.shape_cast %135 : vector<1x1x3xf32> to vector<1x3xf32>
    %137 = vector.shape_cast %134 : vector<1x3xf32> to vector<1x1x3xf32>
    tpu.vector_store %arg13[%c0_73, %c0_74, %c0_75], %137 {strides = array<i32>} : memref<1x1x3xf32, #tpu.memory_space<vmem>>, vector<1x1x3xf32>,
    return
  }
  func.func @transform_0(%arg0: i32) -> (i32, i32, i32) {
    %c0_i32 = arith.constant 0 : i32
    %c0_i32_0 = arith.constant 0 : i32
    %c0_i32_1 = arith.constant 0 : i32
    return %arg0, %c0_i32, %c0_i32_0 : i32, i32, i32
  }
  func.func @transform_1(%arg0: i32) -> (i32, i32) {
    %c0_i32 = arith.constant 0 : i32
    %c0_i32_0 = arith.constant 0 : i32
    %c0_i32_1 = arith.constant 0 : i32
    return %c0_i32, %c0_i32_0 : i32, i32
  }
  func.func @transform_2(%arg0: i32) -> (i32, i32) {
    %c0_i32 = arith.constant 0 : i32
    %c0_i32_0 = arith.constant 0 : i32
    %c0_i32_1 = arith.constant 0 : i32
    return %c0_i32, %c0_i32_0 : i32, i32
  }
  func.func @transform_3(%arg0: i32) -> (i32, i32) {
    %c0_i32 = arith.constant 0 : i32
    %c0_i32_0 = arith.constant 0 : i32
    %c0_i32_1 = arith.constant 0 : i32
    return %c0_i32, %c0_i32_0 : i32, i32
  }
  func.func @transform_4(%arg0: i32) -> (i32, i32) {
    %c0_i32 = arith.constant 0 : i32
    %c0_i32_0 = arith.constant 0 : i32
    %c0_i32_1 = arith.constant 0 : i32
    return %c0_i32, %c0_i32_0 : i32, i32
  }
  func.func @transform_5(%arg0: i32) -> (i32, i32) {
    %c0_i32 = arith.constant 0 : i32
    %c0_i32_0 = arith.constant 0 : i32
    %c0_i32_1 = arith.constant 0 : i32
    return %c0_i32, %c0_i32_0 : i32, i32
  }
  func.func @transform_6(%arg0: i32) -> (i32, i32) {
    %c0_i32 = arith.constant 0 : i32
    %c0_i32_0 = arith.constant 0 : i32
    %c0_i32_1 = arith.constant 0 : i32
    return %c0_i32, %c0_i32_0 : i32, i32
  }
  func.func @transform_7(%arg0: i32) -> (i32, i32) {
    %c0_i32 = arith.constant 0 : i32
    %c0_i32_0 = arith.constant 0 : i32
    %c0_i32_1 = arith.constant 0 : i32
    return %c0_i32, %c0_i32_0 : i32, i32
  }
  func.func @transform_8(%arg0: i32) -> (i32, i32) {
    %c0_i32 = arith.constant 0 : i32
    %c0_i32_0 = arith.constant 0 : i32
    %c0_i32_1 = arith.constant 0 : i32
    return %c0_i32, %c0_i32_0 : i32, i32
  }
  func.func @transform_9(%arg0: i32) -> (i32, i32) {
    %c0_i32 = arith.constant 0 : i32
    %c0_i32_0 = arith.constant 0 : i32
    %c0_i32_1 = arith.constant 0 : i32
    return %c0_i32, %c0_i32_0 : i32, i32
  }
  func.func @transform_10(%arg0: i32) -> (i32, i32) {
    %c0_i32 = arith.constant 0 : i32
    %c0_i32_0 = arith.constant 0 : i32
    %c0_i32_1 = arith.constant 0 : i32
    return %c0_i32, %c0_i32_0 : i32, i32
  }
  func.func @transform_11(%arg0: i32) -> (i32, i32) {
    %c0_i32 = arith.constant 0 : i32
    %c0_i32_0 = arith.constant 0 : i32
    %c0_i32_1 = arith.constant 0 : i32
    return %c0_i32, %c0_i32_0 : i32, i32
  }
  func.func @transform_12(%arg0: i32) -> (i32, i32, i32) {
    %c0_i32 = arith.constant 0 : i32
    %c0_i32_0 = arith.constant 0 : i32
    %c0_i32_1 = arith.constant 0 : i32
    return %arg0, %c0_i32, %c0_i32_0 : i32, i32, i32
  }
}

</mosaic_0001>

<bundles_post_ra>
// kernel: tpu_custom_call.1
= control target key start
LH: loop header
LB: loop body
LE: loop exit
PB: predicated region body
PF: predicated region fallthrough
CT: control target
= control target key end

     0   :  { %s1741_s0 = inlined_call_operand.vmem [shape: f32[2,1,56], index: 0, kind: input, shape index: {}]   ;;  %s1742_s1 = inlined_call_operand.vmem [shape: f32[56,5], index: 1, kind: input, shape index: {}]   ;;  %s1743_s2 = inlined_call_operand.vmem [shape: f32[1,5], index: 2, kind: input, shape index: {}]   ;;  %s1744_s3 = inlined_call_operand.vmem [shape: f32[5,48], index: 3, kind: input, shape index: {}]   ;;  %s1745_s4 = inlined_call_operand.vmem [shape: f32[1,48], index: 4, kind: input, shape index: {}]   ;;  %s1746_s5 = inlined_call_operand.vmem [shape: f32[6,8], index: 5, kind: input, shape index: {}]   ;;  %s1747_s6 = inlined_call_operand.vmem [shape: f32[8,4], index: 6, kind: input, shape index: {}]   ;;  %s1748_s7 = inlined_call_operand.vmem [shape: f32[8,8], index: 7, kind: input, shape index: {}]   ;;  %s1749_s8 = inlined_call_operand.vmem [shape: f32[8,1], index: 8, kind: input, shape index: {}]   ;;  %s1750_s9 = inlined_call_operand.vmem [shape: f32[1,4], index: 9, kind: input, shape index: {}]   ;;  %s1751_s10 = inlined_call_operand.vmem [shape: f32[32,3], index: 10, kind: input, shape index: {}]   ;;  %s1752_s11 = inlined_call_operand.vmem [shape: f32[1,3], index: 11, kind: input, shape index: {}]   ;;  %s1753_s12 = inlined_call_operand.hbm [shape: f32[2,1,3], index: 12, kind: output, shape index: {}]  }
   0x1   :  { %1754 = sst [smem:[#allocation8_spill]] %s1741_s0 }
   0x2   :  { %17 = vsyncpa [#allocation5], 0 }
   0x3   :  { %19 = vsyncpa [#allocation5 + $0x1], 0  ;;  %s1536_s21 = smov 0   ;;  %s1538_s22 = smov 0  }
   0x4   :  { %s1540_s23 = smov 0   ;;  %s1542_s24 = smov 0  }
   0x5 LB: > { %s1557_s25 = sadd.s32 4294967295, %s1452_s24   ;;  %s1215_s26 = sadd.s32 4294967294, %s1452_s24   ;;  %s1452_s24 = sphi %s1542_s24, %s1763_s24   ;;  %s1448_s23 = sphi %s1540_s23, %s1762_s23   ;;  %s1444_s22 = sphi %s1538_s22, %s1761_s22   ;;  %s1440_s21 = sphi %s1536_s21, %s1760_s21  }
   0x6   : > { %s1561_s27 = sadd.s32 1, %s1452_s24   ;;  %s289_s28 = sadd.s32 1, %s1448_s23 }
   0x7   : > { %s286_s29 = ssub.s32 %s1452_s24, %s1561_s27  ;;  %p299_p0 = scmp.ne.s32.totalorder %s1448_s23, %s1444_s22 }
   0x8   : > { %p287_p1 = scmp.eq.s32.totalorder %s286_s29, 0  ;;  %p300_p2 = scmp.eq.s32.totalorder %s1557_s25, 1 }
   0x9   : > { %p305_p3 = scmp.ne.s32.totalorder %s1444_s22, %s1440_s21  ;;  %p306_p4 = scmp.eq.s32.totalorder %s1215_s26, 1 }
   0xa   : > { %s1572_s30 = scalar_select %p287_p1, %s1448_s23, %s289_s28  }
   0xb   : > { %p1574_p5 = por %p300_p2, %p299_p0  ;;  %p1578_p6 = por %p306_p4, %p305_p3 }
   0xc   : > { %1755 = sst [smem:[#allocation7_spill]] %s1572_s30  ;;  %p1218_p7 = scmp.ge.s32.totalorder %s1452_s24, 1 }
   0xd   : > { %p363_p8 = scmp.lt.s32.totalorder %s1452_s24, 3 }
   0xf   : > { %p364_p9 = pnand %p1218_p7, %p363_p8 }
  0x10   : > { %v406_v0 = vld [vmem:[%s1742_s1] sm:$0xff] (!%p364_p9)  ;;  %v407_v1 = vld [vmem:[%s1742_s1 + $0x8] sm:$0xff] (!%p364_p9)  ;;  %v408_v2 = vld [vmem:[%s1742_s1 + $0x10] sm:$0xff] (!%p364_p9)  ;;  %v1454_v3 = vmov (!%p364_p9), 0.0|0.0   ;;  %vm1455_vm0 = vmmov (!%p364_p9), 0   ;;  %v1456_v6 = vmov (!%p364_p9), 0.0   ;;  %v798_v42 = vlaneseq (!%p364_p9) }
  0x11   : > { %367 = sbr.rel (%p364_p9) target bundleno = 2235 (0x8bb), region = 68  ;;  %1308 = vmatprep.subr.bf16.mxu0 (!%p364_p9), %v1454_v3  ;;  %v1309_v4 = vpack.c.bf16 (!%p364_p9), %v407_v1, %v406_v0  ;;  %v409_v5 = vld [vmem:[%s1742_s1 + $0x18] sm:$0xff] (!%p364_p9)  ;;  %1269 = vmatprep.mubr.msk.f32.mxu0 (!%p364_p9), %vm1455_vm0, %v1456_v6  ;;  %p402_p10 = scmp.lt.s32.totalorder (!%p364_p9), %s1557_s25, 1  ;;  %v410_v8 = vld [vmem:[%s1742_s1 + $0x20] sm:$0xff] (!%p364_p9)  ;;  %v411_v9 = vld [vmem:[%s1742_s1 + $0x28] sm:$0xff] (!%p364_p9)  ;;  %vm414_vm1 = vcmask (!%p364_p9), 457728  }
  0x12   : > { %1272 = vmatprep.subr.mxu1 (!%p364_p9), %v1456_v6  ;;  %1274 = vmatprep.mubr.msk.f32.mxu1 (!%p364_p9), %vm1455_vm0, %v1456_v6  ;;  %v1312_v7 = vpack.c.bf16 (!%p364_p9), %v409_v5, %v408_v2  ;;  %v1315_v10 = vpack.c.bf16 (!%p364_p9), %v411_v9, %v410_v8  ;;  %s1758_s0 = sld [smem:[#allocation8_spill]] (!%p364_p9)  ;;  %v412_v11 = vld [vmem:[%s1742_s1 + $0x30] sm:$0xff] (!%p364_p9)  ;;  %v491_v13 = vld [vmem:[%s1744_s3] sm:$0x1f] (!%p364_p9)  ;;  %vm497_vm2 = vcmask (!%p364_p9), 1044480   ;;  %vm493_vm4 = vcmask (!%p364_p9), 39936  }
  0x13   : > { %1310 = vmatpush3.bf16.msra.mxu0 (!%p364_p9), %v1309_v4  ;;  %1273 = vmatpush3.msk.msra.mxu1 (!%p364_p9), %vm497_vm2, %v491_v13  ;;  %v413_v14 = vld [vmem:[%s1743_s2] sm:$0x1] (!%p364_p9)  ;;  %vm574_vm6 = vcmask (!%p364_p9), 40960   ;;  %vm611_vm7 = vcmask (!%p364_p9), 1045504   ;;  %s1458_s28 = smov (!%p364_p9), 122   ;;  %s1459_s29 = smov (!%p364_p9), 104  }
  0x14   : > { %1311 = vmatprep.subr.bf16.mxu0 (!%p364_p9), %v1454_v3  ;;  %1277 = vmatprep.subr.mxu1 (!%p364_p9), %v1456_v6  ;;  %v492_v20 = vld [vmem:[%s1745_s4] sm:$0x1] (!%p364_p9)  ;;  %s1460_s15 = smov (!%p364_p9), 116   ;;  %s1461_s16 = smov (!%p364_p9), 92   ;;  %vm607_vm8 = vcmask (!%p364_p9), 48128   ;;  %v1464_v36 = vmov (!%p364_p9), 1  }
  0x15   : > { %v606_v26 = vld [vmem:[%s1746_s5] sm:$0x3f] (!%p364_p9)  ;;  %s1462_s30 = smov (!%p364_p9), 98   ;;  %s1463_s17 = smov (!%p364_p9), 86   ;;  %1380 = vset.pattern.permute.xlu1 (!%p364_p9), %v1464_v36  ;;  %v1465_v37 = vmov (!%p364_p9), 0   ;;  %vm686_vm9 = vcmask (!%p364_p9), 64512  }
  0x16   : > { %v685_v34 = vld [vmem:[%s1747_s6] sm:$0xff] (!%p364_p9)  ;;  %1381 = vset.pattern.permute.xlu0 (!%p364_p9), %v1465_v37  ;;  %v799_v43 = vshrl.u32 (!%p364_p9), %v798_v42, 7  ;;  %vm1061_vm2 = vcmask (!%p364_p9), 190594  }
  0x17   : > { %1313 = vmatpush3.bf16.msra.mxu0 (!%p364_p9), %v1312_v7  ;;  %v792_v50 = vld [vmem:[%s1748_s7] sm:$0xff] (!%p364_p9) }
  0x18   : > { %s403_s18 = scalar_select %p402_p10, %s1557_s25, 1  ;;  %1314 = vmatprep.subr.bf16.mxu0 %v1454_v3  ;;  %v800_v45 = vsub.s32 2, %v799_v43  ;;  %v829_v46 = vsub.s32 3, %v799_v43  ;;  %vm806_vm10 = vcmp.gt.f32.partialorder %v792_v50, 0.0 }
  0x1a   : > { %s404_s26 = scalar_lea.vmem %s1758_s0, %s403_s18  ;;  %s400_s18 = sand.u32 1, %s1444_s22  }
  0x1b   : > { %1316 = vmatpush3.bf16.msra.mxu0 %v1315_v10  ;;  %v405_v12 = vld [vmem:[%s404_s26] sm:$0x1]  ;;  %s1457_s26 = smov 110  }
  0x1c   : > { %1267 = vmatprep.subr.mxu0 %v1456_v6 }
  0x1f   : > { %1268 = vmatpush3.msra.mxu0 %v412_v11 }
  0x20   : > { %1270 = vmatmul.mubr.msk.f32.vlgmr.msra.gmra.mrb[0].mxu0 %vm414_vm1, %v405_v12  ;;  %1317 = vmatprep.subr.bf16.mxu0 %v1454_v3  ;;  %v1000_v12 = vld [vmem:[%s1749_s8] sm:$0xff]  ;;  %vm1056_vm1 = vcmask 123969  }
  0x21   : > { %1305 = vmatprep.mubr.msk.f32.mxu0 %vm1455_vm0, %v1456_v6 }
  0xf3   : > { %v484_v15 = vpop.f32.mrb[0].mxu0 }
  0xf4   : > { %v485_v16 = vadd.f32 %v484_v15, %v413_v14  ;;  %v1271_v17 = vpop.f32.mrb[1].mxu0 }
  0xf6   : > { %vm488_vm3 = vcmp.ge.f32.partialorder %v485_v16, 0.0  ;;  %v489_v18 = vmul.f32 0.01, %v485_v16 }
  0xf8   : > { %v490_v19 = vsel %vm488_vm3, %v485_v16, %v489_v18  ;;  %vm1066_vm3 = vcmask 257219  }
  0xf9   : > { %1275 = vmatmul.mubr.msk.f32.vlgmr.msra.gmra.mrb[0].mxu1 %vm493_vm4, %v490_v19  ;;  %vm1074_vm4 = vcmask 261120  }
  0xfa   : > { %1279 = vmatprep.mubr.msk.f32.mxu1 %vm1455_vm0, %v1456_v6  ;;  %1278 = vmatpush3.msk.msra.mxu1 %vm611_vm7, %v606_v26 }
  0xfb   : > { %1282 = vmatprep.subr.mxu1 %v1456_v6 }
 0x1cc   : > { %v567_v21 = vpop.f32.mrb[0].mxu1 }
 0x1cd   : > { %v568_v22 = vadd.f32 %v567_v21, %v492_v20  ;;  %v1276_v23 = vpop.f32.mrb[1].mxu1 }
 0x1cf   : > { %vm571_vm5 = vcmp.ge.f32.partialorder %v568_v22, 0.0  ;;  %v572_v24 = vmul.f32 0.01, %v568_v22 }
 0x1d1   : > { %v573_v25 = vsel %vm571_vm5, %v568_v22, %v572_v24  ;;  %v1227_v24 = vld [vmem:[%s1750_s9] ss:$0 sm:$0xff]  ;;  %vm1148_vm5 = vcmask 16384  }
 0x1d2   : > { %585 = vrot.lane.b32.xlu1 %v573_v25, %s1457_s26  ;;  %577 = vrot.lane.b32.xlu0 %v573_v25, %s1458_s28  ;;  %575 = vst.msk [vmem:[#allocation2] sm:$0x1] %vm574_vm6, %v573_v25  ;;  %s1466_s28 = smov 124   ;;  %s1229_s26 = sshll.u32 %s1557_s25, 4 }
 0x1d3   : > { %s1470_s25 = smov [#allocation4]  }
 0x1d4   : > { %s1394_s20 = sshll.u32 %s1470_s25, 4  ;;  %s1395_s20 = int_to_ptr.vmem [resolvable:$false] %s1394_s20 }
 0x1d5   : > { %s1396_s0 = scalar_lea.vmem %s1395_s20, 32 }
 0x1d6   : > { %589 = vrot.lane.b32.xlu1 %v573_v25, %s1459_s29  ;;  %581 = vrot.lane.b32.xlu0 %v573_v25, %s1460_s15 }
 0x1da   : > { %597 = vrot.lane.b32.xlu1 %v573_v25, %s1461_s16  ;;  %593 = vrot.lane.b32.xlu0 %v573_v25, %s1462_s30  ;;  %s1467_s16 = smov 8   ;;  %s1468_s30 = smov 16  }
 0x1de   : > { %601 = vrot.lane.b32.xlu0 %v573_v25, %s1463_s17  ;;  %s1469_s17 = smov 24  }
 0x244   : > { %v586_v27 = vpop.permute.xlu1 %585  ;;  %v578_v28 = vpop.permute.xlu0 %577 }
 0x245   : > { %588 = vst.msk [vmem:[#allocation2 + $0x3] sm:$0x1] %vm574_vm6, %v586_v27  ;;  %580 = vst.msk [vmem:[#allocation2 + $0x1] sm:$0x1] %vm574_vm6, %v578_v28 }
 0x248   : > { %v590_v29 = vpop.permute.xlu1 %589  ;;  %v582_v30 = vpop.permute.xlu0 %581 }
 0x249   : > { %592 = vst.msk [vmem:[#allocation2 + $0x4] sm:$0x1] %vm574_vm6, %v590_v29  ;;  %584 = vst.msk [vmem:[#allocation2 + $0x2] sm:$0x1] %vm574_vm6, %v582_v30  ;;  %v1070_v30 = vld [vmem:[%s1751_s10 + $0x8] sm:$0xff] }
 0x24c   : > { %v598_v31 = vpop.permute.xlu1 %597  ;;  %v594_v32 = vpop.permute.xlu0 %593 }
 0x24d   : > { %600 = vst.msk [vmem:[#allocation2 + $0x6] sm:$0x1] %vm574_vm6, %v598_v31  ;;  %596 = vst.msk [vmem:[#allocation2 + $0x5] sm:$0x1] %vm574_vm6, %v594_v32  ;;  %v1071_v32 = vld [vmem:[%s1751_s10 + $0x10] sm:$0xff] }
 0x250   : > { %v602_v33 = vpop.permute.xlu0 %601 }
 0x251   : > { %604 = vst.msk [vmem:[#allocation2 + $0x7] sm:$0x1] %vm574_vm6, %v602_v33  ;;  %v1072_v33 = vld [vmem:[%s1751_s10 + $0x18] sm:$0xff] }
 0x258   : > { %v605_v35 = vld [vmem:[#allocation2] sm:$0xff] }
 0x259   : > { %1280 = vmatmul.mubr.msk.f32.vlgmr.msra.gmra.mrb[2].mxu1 %vm607_vm8, %v605_v35 }
 0x25a   : > { %1283 = vmatpush3.msra.mxu1 %v685_v34  ;;  %1284 = vmatprep.mubr.msk.f32.mxu1 %vm1455_vm0, %v1456_v6  ;;  %v1321_v34 = vpack.c.bf16 %v1072_v33, %v1071_v32 }
 0x25b   : > { %1287 = vmatprep.subr.mxu1 %v1456_v6 }
 0x32c   : > { %v1652_v38 = vpop.f32.mrb[2].mxu1 }
 0x32d   : > { %v1281_v39 = vpop.f32.mrb[3].mxu1  ;;  %1285 = vmatmul.mubr.msk.f32.vlgmr.msra.gmra.mrb[4].mxu1 %vm686_vm9, %v1652_v38 }
 0x32e   : > { %1289 = vmatprep.mubr.msk.f32.mxu1 %vm1455_vm0, %v1456_v6  ;;  %v1073_v39 = vld [vmem:[%s1752_s11] sm:$0x1] }
 0x400   : > { %v756_v40 = vpop.f32.mrb[4].mxu1 }
 0x401   : > { %795 = vperm.xlu0 %1381, %v756_v40   ;;  %824 = vperm.xlu1 %1380, %v756_v40   ;;  %v1286_v41 = vpop.f32.mrb[5].mxu1 }
 0x42a   : > { %760 = vxpose.xlu1.b32.start.end [1/1] (short) (narrow) %v756_v40, 8 }
 0x480   : > { %v825_v44 = vpop.permute.xlu1 %824  ;;  %v796_v51 = vpop.permute.xlu0 %795 }
 0x4aa   : > { %v776_v47 = vpop.trf.xlu1 }
 0x4ab   : > { %v801_v48 = vrot.slane %v776_v47, %v800_v45  ;;  %v830_v49 = vrot.slane %v776_v47, %v829_v46 }
 0x4ad   : > { %v802_v52 = vadd.f32 %v801_v48, %v796_v51  ;;  %v831_v53 = vadd.f32 %v830_v49, %v825_v44 }
 0x4af   : > { %vm832_vm11 = vcmp.ge.f32.partialorder %v831_v53, 0.0  ;;  %v833_v54 = vmul.f32 0.2, %v831_v53  ;;  %vm803_vm12 = vcmp.ge.f32.partialorder %v802_v52, 0.0  ;;  %v804_v55 = vmul.f32 0.2, %v802_v52 }
 0x4b1   : > { %v834_v56 = vsel %vm832_vm11, %v831_v53, %v833_v54  ;;  %v805_v57 = vsel %vm803_vm12, %v802_v52, %v804_v55 }
 0x4b2   : > { %v835_v58 = vsel %vm806_vm10, %v834_v56, -1e+30  ;;  %v807_v60 = vsel %vm806_vm10, %v805_v57, -1e+30 }
 0x4b3   : > { %v836_v59 = vsel %vm686_vm9, %v835_v58, -inf  ;;  %v808_v61 = vsel %vm686_vm9, %v807_v60, -inf }
 0x4b4   : > { %837 = vmax.xlane.f32.xlu0 %v836_v59 }
 0x4b8   : > { %809 = vmax.xlane.f32.xlu0 %v808_v61 }
 0x541   : > { %v838_v62 = vpop.xlane.xlu0 %837 }
 0x542   : > { %v839_v63 = vsub.f32 %v835_v58, %v838_v62 }
 0x544   : > { %v840_v0 = vmul.f32 1.442695, %v839_v63 }
 0x545   : > { %v810_v1 = vpop.xlane.xlu0 %809 }
 0x546   : > { %1382 = vpow2.f32 %v840_v0  ;;  %v811_v2 = vsub.f32 %v807_v60, %v810_v1 }
 0x548   : > { %v812_v4 = vmul.f32 1.442695, %v811_v2 }
 0x54a   : > { %1384 = vpow2.f32 %v812_v4 }
 0x550   : > { %v1383_v5 = vpop.eup %1382 }
 0x551   : > { %v842_v7 = vmul.f32 %v1383_v5, %v792_v50 }
 0x553   : > { %v843_v8 = vsel %vm686_vm9, %v842_v7, 0.0 }
 0x554   : > { %v1385_v9 = vpop.eup %1384  ;;  %844 = vadd.xlane.f32.xlu1 %v843_v8 }
 0x555   : > { %v814_v10 = vmul.f32 %v1385_v9, %v792_v50 }
 0x557   : > { %v815_v11 = vsel %vm686_vm9, %v814_v10, 0.0 }
 0x558   : > { %816 = vadd.xlane.f32.xlu0 %v815_v11 }
 0x56e   : > { %851 = vrot.lane.b32.xlu0 %v1652_v38, %s1466_s28  ;;  %s401_s28 = scalar_lea.vmem [#allocation4], %s400_s18 }
 0x56f   : > { %s1163_s29 = sshll.u32 %s401_s28, 4  ;;  %s1701_s29 = int_to_ptr.vmem [resolvable:$true] %s1163_s29 }
 0x570   : > { %s1390_s19 = scalar_lea.vmem %s1701_s29, 16  ;;  %p1397_p0 = scmp.lt.s32.totalorder %s1701_s29, %s1395_s20 }
 0x571   : > { %p1391_p11 = scmp.ne.s32.totalorder %s1701_s29, %s1390_s19  ;;  %p1398_p1 = scmp.lt.s32.totalorder %s1396_s0, %s1390_s19 }
 0x572   : > { %1003 = vperm.xlu0 %1381, %v1000_v12  }
 0x573   : > { %p1392_p12 = pnand %p1391_p11, %p1574_p5  ;;  %p1399_p2 = por %p1398_p1, %p1397_p0 }
 0x575   : > { %p1393_p13 = pneg %p1392_p12 }
 0x577   : > { %p1400_p3 = pnand %p1399_p2, %p1393_p13 }
 0x5e1   : > { %v845_v13 = vpop.xlane.xlu1 %844 }
 0x5e2   : > { %1386 = vrcp.f32 %v845_v13  ;;  %vm846_vm13 = vcmp.gt.f32.partialorder %v845_v13, 0.0 }
 0x5e5   : > { %v817_v14 = vpop.xlane.xlu0 %816 }
 0x5e6   : > { %1388 = vrcp.f32 %v817_v14  ;;  %vm818_vm14 = vcmp.gt.f32.partialorder %v817_v14, 0.0 }
 0x5e9   : > { %v852_v15 = vpop.permute.xlu0 %851 }
 0x5ea   : > { %1288 = vmatpush3.msra.mxu1 %v852_v15 }
 0x5eb   : > { %1292 = vmatprep.subr.mxu1 %v1456_v6 }
 0x5ec   : > { %v1387_v16 = vpop.eup %1386 }
 0x5ed   : > { %v849_v17 = vsel %vm846_vm13, %v1387_v16, 0.0 }
 0x5ee   : > { %v850_v18 = vmul.f32 %v849_v17, %v842_v7 }
 0x5f0   : > { %v1389_v19 = vpop.eup %1388  ;;  %1290 = vmatmul.mubr.msk.f32.vlgmr.msra.gmra.mrb[6].mxu1 %vm686_vm9, %v850_v18 }
 0x5f1   : > { %1293 = vmatpush3.msra.mxu1 %v1652_v38  ;;  %1294 = vmatprep.mubr.msk.f32.mxu1 %vm1455_vm0, %v1456_v6  ;;  %v821_v20 = vsel %vm818_vm14, %v1389_v19, 0.0  ;;  %v1004_v22 = vpop.permute.xlu0 %1003  ;;  %v1069_v6 = vld [vmem:[%s1751_s10] sm:$0xff]  ;;  %vm1050_vm0 = vcmask 57344  }
 0x5f2   : > { %v822_v21 = vmul.f32 %v821_v20, %v814_v10  ;;  %v1318_v31 = vpack.c.bf16 %v1070_v30, %v1069_v6 }
 0x5f4   : > { %1319 = vmatpush3.bf16.msra.mxu0 %v1318_v31 }
 0x5f5   : > { %1320 = vmatprep.subr.bf16.mxu0 %v1454_v3 }
 0x5f8   : > { %1295 = vmatmul.mubr.msk.f32.vlgmr.msra.gmra.mrb[6].mxu1 %vm686_vm9, %v822_v21  ;;  %1322 = vmatpush3.bf16.msra.mxu0 %v1321_v34 }
 0x6cb   : > { %v996_v23 = vpop.f32.mrb[6].mxu1 }
 0x6cc   : > { %v1006_v25 = vmul.f32 %v1004_v22, %v996_v23  ;;  %v1296_v26 = vpop.f32.mrb[7].mxu1 }
 0x6ce   : > { %v1014_v27 = vadd.f32 %v1227_v24, %v1006_v25 }
 0x6d0   : > { %vm1015_vm15 = vcmp.ge.f32.partialorder %v1014_v27, 0.0  ;;  %v1016_v28 = vmul.f32 0.01, %v1014_v27 }
 0x6d2   : > { %v1017_v29 = vsel %vm1015_vm15, %v1014_v27, %v1016_v28 }
 0x6d3   : > { %1018 = vxpose.xlu0.b32.start.end [1/1] (short) (narrow) %v1017_v29, 8 }
 0x753   : > { %v1034_v35 = vpop.trf.xlu0 }
 0x754   : > { %1051 = vst.msk [vmem:[#allocation3] sm:$0x1] %vm1050_vm0, %v1034_v35  ;;  %1053 = vrot.lane.b32.xlu1 %v1034_v35, %s1467_s16 }
 0x758   : > { %1058 = vrot.lane.b32.xlu1 %v1034_v35, %s1468_s30  ;;  %s1699_s30 = scalar_lea.hbm %s1753_s12, %s1229_s26 }
 0x75c   : > { %1063 = vrot.lane.b32.xlu1 %v1034_v35, %s1469_s17  ;;  %s1151_s17 = scalar_lea.sflag [#allocation5], %s400_s18 }
 0x7c6   : > { %v1054_v36 = vpop.permute.xlu1 %1053 }
 0x7c7   : > { %1057 = vst.msk [vmem:[#allocation3 - $0x1] sm:$0x2] %vm1056_vm1, %v1054_v36 }
 0x7ca   : > { %v1059_v37 = vpop.permute.xlu1 %1058 }
 0x7cb   : > { %1062 = vst.msk [vmem:[#allocation3 - $0x2] sm:$0x4] %vm1061_vm2, %v1059_v37 }
 0x7ce   : > { %v1064_v38 = vpop.permute.xlu1 %1063 }
 0x7cf   : > { %1067 = vst.msk [vmem:[#allocation3 - $0x3] sm:$0x8] %vm1066_vm3, %v1064_v38 }
 0x7d6   : > { %v1068_v3 = vld [vmem:[#allocation3] sm:$0x1] }
 0x7d7   : > { %1306 = vmatmul.mubr.msk.f32.vlgmr.msra.gmra.mrb[2].mxu0 %vm1074_vm4, %v1068_v3 }
 0x8aa   : > { %v1144_v40 = vpop.f32.mrb[2].mxu0 }
 0x8ab   : > { %v1145_v41 = vadd.f32 %v1144_v40, %v1073_v39  ;;  %v1307_v42 = vpop.f32.mrb[3].mxu0 }
 0x8ad   : > { %1149 = vst.msk [vmem:[%s401_s28] sm:$0x1] %vm1148_vm5, %v1145_v41 }
 0x8ae   : > { %1403 = shalt.err (!%p1400_p3)
}
 0x8af   : > { %s1404_s18 = scalar_lea.hbm %s1699_s30, 16  ;;  %s1408_s15 = scalar_lea.hbm %s1753_s12, 32 }
 0x8b0   : > { %p1405_p4 = scmp.ne.s32.totalorder %s1699_s30, %s1404_s18  ;;  %p1409_p9 = scmp.lt.u32.totalorder %s1699_s30, %s1753_s12 }
 0x8b1   : > { %p1410_p10 = scmp.lt.u32.totalorder %s1408_s15, %s1404_s18  ;;  %p1412_p12 = scmp.lt.u32.totalorder %s1404_s18, %s1699_s30 }
 0x8b2   : > { %p1406_p7 = pnand %p1405_p4, %p1574_p5 }
 0x8b3   : > { %p1411_p11 = por %p1410_p10, %p1409_p9 }
 0x8b4   : > { %p1407_p8 = pneg %p1406_p7 }
 0x8b5   : > { %p1413_p13 = por %p1412_p12, %p1411_p11 }
 0x8b7   : > { %p1414_p0 = pnand %p1413_p13, %p1407_p8 }
 0x8b9   : > { %1417 = shalt.err (!%p1414_p0)
}
 0x8ba   : > { %1325 = dma.vmem_to_hbm [thread:$0]  (%p1574_p5), %s1701_s29, 16, %s1699_s30, %s1151_s17  }
 0x8bb PF: > { %p1331_p1 = scmp.ge.s32.totalorder %s1452_s24, 2  ;;  %s1175_s0 = sand.u32 1, %s1440_s21  }
 0x8bc   : > { %s1176_s19 = scalar_lea.sflag [#allocation5], %s1175_s0 }
 0x8bd   : > { %p1328_p2 = pnand %p1331_p1, %p1578_p6 }
 0x8bf   : > { %1435 = dma.done.wait (!%p1328_p2), %s1176_s19, 16  }
 0x8c0   : > { %1437 = vsyncadd (!%p1328_p2), %s1176_s19, 4294967280  ;;  %s1759_s20 = sld [smem:[#allocation7_spill]]  ;;  %p22_p3 = scmp.ge.s32.totalorder %s1561_s27, 4  }
 0x8c1   : > { %s1760_s21 = smov %s1444_s22  ;;  %s1761_s22 = smov %s1448_s23 }
 0x8c2   : > { %s1763_s24 = smov %s1561_s27  ;;  %24 = sbr.rel (!%p22_p3) target bundleno = 5 (0x5), region = 103 }
 0x8c6   : > { %s1762_s23 = smov %s1759_s20 }
 0x8c9   :  { %1180 = vsyncpa [#allocation5], 1 }
 0x8ca   :  { %1182 = vsyncpa [#allocation5 + $0x1], 1 }

</bundles_post_ra>
